<compile_context>
chip_gen: v5e
topology: v5e:2x2
jax: 0.10.0
libtpu: 0.0.40
codegen_flags: <defaults>
</compile_context>

<pallas_src>
import functools

import jax
import jax.numpy as jnp
from jax.experimental import pallas as pl
from jax.experimental.pallas import tpu as pltpu

_LANE = 128
_SUBLANE = 8


def _mse_kernel(x_ref, y_ref, o_ref, acc_ref, *, scale, total_rows,
                block_rows, mask_tail):
    i = pl.program_id(0)

    @pl.when(i == 0)
    def _():
        acc_ref[...] = jnp.zeros_like(acc_ref)

    d = x_ref[...].astype(jnp.float32) - y_ref[...].astype(jnp.float32)
    sq = d * d

    if mask_tail:
        # The last block may extend past the real rows; those rows hold
        # garbage (no runtime bounds check on VMEM reads) -> zero them.
        row_ids = jax.lax.broadcasted_iota(jnp.int32, sq.shape, 0) + i * block_rows
        sq = jnp.where(row_ids < total_rows, sq, 0.0)

    # Fold (block_rows, 128) -> (8, 128): pure vector adds (VPU), no XLU.
    acc_ref[...] += jnp.sum(
        sq.reshape(block_rows // _SUBLANE, _SUBLANE, _LANE), axis=0
    )

    @pl.when(i == pl.num_programs(0) - 1)
    def _():
        # Single full reduce + (factor^2 / n) scaling, once per kernel.
        o_ref[0, 0] = jnp.sum(acc_ref[...]) * jnp.float32(scale)


def mse_loss_pallas(inputs, targets, value_range=(0.0, 1.0), block_rows=2048):
    """Scaled MSE loss. Returns a float32 scalar."""
    assert inputs.shape == targets.shape, "inputs/targets must have same shape"
    range_min, range_max = value_range
    factor = 1.0 / (range_max - range_min)

    n_elems = int(inputs.size)
    # Hoisted scaling: mean((x*f - y*f)^2) == f^2/n * sum((x - y)^2).
    scale = (factor * factor) / float(n_elems)

    # Flatten in native dtype (free for contiguous arrays).
    x = jnp.ravel(inputs)
    y = jnp.ravel(targets)

    # Only pad when the element count is not a multiple of 8*128 (keeps the
    # fast path copy-free; zero padding contributes zero to the sum).
    chunk = _SUBLANE * _LANE
    padded = pl.cdiv(n_elems, chunk) * chunk
    pad = padded - n_elems
    if pad:
        x = jnp.pad(x, (0, pad))
        y = jnp.pad(y, (0, pad))

    rows = padded // _LANE
    x2 = x.reshape(rows, _LANE)
    y2 = y.reshape(rows, _LANE)

    if rows <= block_rows:
        br = rows            # single full-extent block (always legal)
        mask_tail = False
    else:
        # Multiple of 256 rows: legal for f32/bf16/int8 tiling, big enough to
        # amortize per-step overhead; ragged last block handled by masking.
        br = max(256, (block_rows // 256) * 256)
        mask_tail = (rows % br) != 0

    grid = (pl.cdiv(rows, br),)

    kernel = functools.partial(
        _mse_kernel, scale=scale, total_rows=rows, block_rows=br,
        mask_tail=mask_tail)

    out = pl.pallas_call(
        kernel,
        out_shape=jax.ShapeDtypeStruct((1, 1), jnp.float32),
        grid_spec=pltpu.PrefetchScalarGridSpec(
            num_scalar_prefetch=0,
            grid=grid,
            in_specs=[
                pl.BlockSpec((br, _LANE), lambda i: (i, 0)),
                pl.BlockSpec((br, _LANE), lambda i: (i, 0)),
            ],
            out_specs=pl.BlockSpec(
                (1, 1), lambda i: (0, 0), memory_space=pltpu.SMEM
            ),
            scratch_shapes=[pltpu.VMEM((_SUBLANE, _LANE), jnp.float32)],
        ),
        compiler_params=pltpu.CompilerParams(
            dimension_semantics=("arbitrary",),
        ),
    )(x2, y2)

    return out[0, 0]


def _mse_ref(inputs, targets, value_range=(0.0, 1.0)):
    range_min, range_max = value_range
    factor = 1.0 / (range_max - range_min)
    d = inputs.astype(jnp.float32) * factor - targets.astype(jnp.float32) * factor
    return jnp.mean(d * d)


if __name__ == "__main__":
    key = jax.random.PRNGKey(0)
    k1, k2, k3, k4, k5, k6 = jax.random.split(key, 6)

    # --- main demo: NCHW f32 tensors feeding the loss ---
    x = jax.random.uniform(k1, (2, 4, 16, 16), dtype=jnp.float32)
    t = jax.random.uniform(k2, (2, 4, 16, 16), dtype=jnp.float32)
    loss = jax.block_until_ready(mse_loss_pallas(x, t, value_range=(0.0, 1.0)))
    ref = _mse_ref(x, t, value_range=(0.0, 1.0))
    assert jnp.allclose(loss, ref, rtol=1e-5, atol=1e-6), (loss, ref)

    # --- bf16 inputs, non-unit value range (in-kernel cast path) ---
    xb = jax.random.uniform(k3, (2, 4, 16, 16), dtype=jnp.float32).astype(jnp.bfloat16)
    tb = jax.random.uniform(k4, (2, 4, 16, 16), dtype=jnp.float32).astype(jnp.bfloat16)
    loss_b = jax.block_until_ready(mse_loss_pallas(xb, tb, value_range=(-1.0, 1.0)))
    ref_b = _mse_ref(xb, tb, value_range=(-1.0, 1.0))
    assert jnp.allclose(loss_b, ref_b, rtol=1e-4, atol=1e-6), (loss_b, ref_b)

    # --- ragged element count (pad path) + multi-block ragged tail (mask path) ---
    xr = jax.random.uniform(k5, (1, 1, 320, 128), dtype=jnp.float32)
    tr = jax.random.uniform(k6, (1, 1, 320, 128), dtype=jnp.float32)
    loss_r = jax.block_until_ready(
        mse_loss_pallas(xr, tr, value_range=(0.0, 2.0), block_rows=256))
    ref_r = _mse_ref(xr, tr, value_range=(0.0, 2.0))
    assert jnp.allclose(loss_r, ref_r, rtol=1e-5, atol=1e-6), (loss_r, ref_r)

    print("KERNEL_OK")
</pallas_src>

<mosaic_0001>
module attributes {stable_mosaic.version = 11 : i64} {
  func.func @_mse_kernel(%arg0: i32, %arg1: memref<16x128xf32, #tpu.memory_space<vmem>>, %arg2: memref<16x128xf32, #tpu.memory_space<vmem>>, %arg3: memref<1x1xf32, #tpu.memory_space<smem>>, %arg4: memref<8x128xf32, #tpu.memory_space<vmem>>) attributes {dimension_semantics = [#tpu.dimension_semantics<arbitrary>], iteration_bounds = array<i64: 1>, scalar_prefetch = 0 : i64, scratch_operands = 1 : i64, tpu.core_type = #tpu.core_type<tc>, window_params = [{transform_indices = @transform_0, window_bounds = array<i64: 16, 128>}, {transform_indices = @transform_1, window_bounds = array<i64: 16, 128>}, {transform_indices = @transform_2, window_bounds = array<i64: 1, 1>}]} {
    %c0_i32 = arith.constant 0 : i32
    %0 = arith.cmpi eq, %arg0, %c0_i32 : i32
    %1 = arith.extui %0 : i1 to i32
    %c0_i32_0 = arith.constant 0 : i32
    %2 = arith.cmpi ne, %1, %c0_i32_0 : i32
    scf.if %2 {
      %cst_10 = arith.constant 0.000000e+00 : f32
      %15 = vector.broadcast %cst_10 : f32 to vector<8x128xf32>
      %c0_11 = arith.constant 0 : index
      %c0_12 = arith.constant 0 : index
      %16 = vector.load %arg4[%c0_11, %c0_12] : memref<8x128xf32, #tpu.memory_space<vmem>>, vector<8x128xf32>
      tpu.vector_store %arg4[%c0_11, %c0_12], %15 {strides = array<i32>} : memref<8x128xf32, #tpu.memory_space<vmem>>, vector<8x128xf32>,
    } else {
    }
    %c0 = arith.constant 0 : index
    %c0_1 = arith.constant 0 : index
    %3 = vector.load %arg1[%c0, %c0_1] : memref<16x128xf32, #tpu.memory_space<vmem>>, vector<16x128xf32>
    %c0_2 = arith.constant 0 : index
    %c0_3 = arith.constant 0 : index
    %4 = vector.load %arg2[%c0_2, %c0_3] : memref<16x128xf32, #tpu.memory_space<vmem>>, vector<16x128xf32>
    %5 = arith.subf %3, %4 : vector<16x128xf32>
    %6 = arith.mulf %5, %5 : vector<16x128xf32>
    %c0_4 = arith.constant 0 : index
    %c0_5 = arith.constant 0 : index
    %7 = vector.load %arg4[%c0_4, %c0_5] : memref<8x128xf32, #tpu.memory_space<vmem>>, vector<8x128xf32>
    %8 = vector.shape_cast %6 : vector<16x128xf32> to vector<2x8x128xf32>
    %cst = arith.constant dense<0.000000e+00> : vector<8x128xf32>
    %9 = vector.multi_reduction <add>, %8, %cst [0] : vector<2x8x128xf32> to vector<8x128xf32>
    %10 = arith.addf %7, %9 : vector<8x128xf32>
    %c0_6 = arith.constant 0 : index
    %c0_7 = arith.constant 0 : index
    %11 = vector.load %arg4[%c0_6, %c0_7] : memref<8x128xf32, #tpu.memory_space<vmem>>, vector<8x128xf32>
    tpu.vector_store %arg4[%c0_6, %c0_7], %10 {strides = array<i32>} : memref<8x128xf32, #tpu.memory_space<vmem>>, vector<8x128xf32>,
    %c0_i32_8 = arith.constant 0 : i32
    %12 = arith.cmpi eq, %arg0, %c0_i32_8 : i32
    %13 = arith.extui %12 : i1 to i32
    %c0_i32_9 = arith.constant 0 : i32
    %14 = arith.cmpi ne, %13, %c0_i32_9 : i32
    scf.if %14 {
      %c0_10 = arith.constant 0 : index
      %c0_11 = arith.constant 0 : index
      %15 = vector.load %arg4[%c0_10, %c0_11] : memref<8x128xf32, #tpu.memory_space<vmem>>, vector<8x128xf32>
      %16 = vector.shape_cast %15 : vector<8x128xf32> to vector<1x8x128xf32>
      %cst_12 = arith.constant dense<0.000000e+00> : vector<1xf32>
      %17 = vector.multi_reduction <add>, %16, %cst_12 [1, 2] : vector<1x8x128xf32> to vector<1xf32>
      %18 = vector.shape_cast %17 : vector<1xf32> to vector<1x1x1xf32>
      %19 = vector.extract %18[0, 0, 0] : f32 from vector<1x1x1xf32>
      %cst_13 = arith.constant 4.8828125E-4 : f32
      %20 = arith.mulf %19, %cst_13 : f32
      %c0_14 = arith.constant 0 : index
      %c0_15 = arith.constant 0 : index
      %21 = memref.load %arg3[%c0_14, %c0_15] : memref<1x1xf32, #tpu.memory_space<smem>>
      memref.store %20, %arg3[%c0_14, %c0_15] : memref<1x1xf32, #tpu.memory_space<smem>>
    } else {
    }
    return
  }
  func.func @transform_0(%arg0: i32) -> (i32, i32) {
    %c0_i32 = arith.constant 0 : i32
    %c0_i32_0 = arith.constant 0 : i32
    return %arg0, %c0_i32 : i32, i32
  }
  func.func @transform_1(%arg0: i32) -> (i32, i32) {
    %c0_i32 = arith.constant 0 : i32
    %c0_i32_0 = arith.constant 0 : i32
    return %arg0, %c0_i32 : i32, i32
  }
  func.func @transform_2(%arg0: i32) -> (i32, i32) {
    %c0_i32 = arith.constant 0 : i32
    %c0_i32_0 = arith.constant 0 : i32
    %c0_i32_1 = arith.constant 0 : i32
    return %c0_i32, %c0_i32_0 : i32, i32
  }
}

</mosaic_0001>

<bundles_post_ra>
// kernel: tpu_custom_call.1
= control target key start
LH: loop header
LB: loop body
LE: loop exit
PB: predicated region body
PF: predicated region fallthrough
CT: control target
= control target key end

     0   :  { %7 = vsyncpa [#allocation4], 0  ;;  %s196_s0 = inlined_call_operand.hbm [shape: f32[16,128], index: 0, kind: input, shape index: {}]   ;;  %s197_s1 = inlined_call_operand.hbm [shape: f32[16,128], index: 1, kind: input, shape index: {}]   ;;  %s198_s2 = inlined_call_operand.hbm [shape: f32[1,1], index: 2, kind: output, shape index: {}]  }
   0x1   :  { %8 = vsyncpa [#allocation7], 0 }
   0x2   :  { %9 = vsyncpa [#allocation5], 0  ;;  %s14_s11 = sshll.u32 %s196_s0, 4  ;;  %s167_s12 = smov [#allocation3]   ;;  %s15_s11 = int_to_ptr.hbm [resolvable:$true] %s14_s11 }
   0x3   :  { %s16_s13 = sshll.u32 %s167_s12, 4  ;;  %s27_s16 = sshll.u32 %s197_s1, 4  ;;  %s17_s13 = int_to_ptr.vmem [resolvable:$true] %s16_s13  ;;  %s28_s16 = int_to_ptr.hbm [resolvable:$true] %s27_s16 }
   0x4   :  { %s168_s17 = smov 128   ;;  %s169_s18 = smov 8  }
   0x5   :  { %22 = dma.hbm_to_vmem [thread:$0]  %s15_s11, 256, %s17_s13, [#allocation4], %s168_s17, %s168_s17, %s169_s18  }
   0x6   :  { %s170_s19 = smov [#allocation6]  }
   0x7   :  { %s29_s20 = sshll.u32 %s170_s19, 4  ;;  %s30_s20 = int_to_ptr.vmem [resolvable:$true] %s29_s20 }
   0x8   :  { %35 = dma.hbm_to_vmem [thread:$0]  %s28_s16, 256, %s30_s20, [#allocation7], %s168_s17, %s168_s17, %s169_s18  }
   0x9   :  { %161 = dma.done.wait [#allocation4], 256  }
   0xa   :  { %162 = vsyncadd [#allocation4], 4294967040 }
   0xb   :  { %163 = dma.done.wait [#allocation7], 256  }
   0xc   :  { %164 = vsyncadd [#allocation7], 4294967040  ;;  %v49_v0 = vld [vmem:[#allocation3] sm:$0xff]  ;;  %v50_v1 = vld [vmem:[#allocation3 + $0x8] sm:$0xff]  ;;  %s82_s21 = sshll.u32 %s198_s2, 4  ;;  %s171_s24 = smov [#allocation8]   ;;  %s83_s21 = int_to_ptr.hbm [resolvable:$true] %s82_s21 }
   0xd   :  { %v51_v2 = vld [vmem:[#allocation6] sm:$0xff]  ;;  %v52_v3 = vld [vmem:[#allocation6 + $0x8] sm:$0xff] }
   0xe   :  { %v53_v4 = vsub.f32 %v49_v0, %v51_v2  ;;  %v54_v5 = vsub.f32 %v50_v1, %v52_v3 }
  0x10   :  { %v55_v6 = vmul.f32 %v53_v4, %v53_v4  ;;  %v56_v7 = vmul.f32 %v54_v5, %v54_v5 }
  0x12   :  { %v58_v8 = vadd.f32 %v56_v7, %v55_v6 }
  0x14   :  { %65 = vadd.xlane.f32.xlu0 %v58_v8 }
  0x87   :  { %v66_v9 = vpop.xlane.xlu0 %65 }
  0x88   :  { %v67_v10 = vrot.slane %v66_v9, 4 }
  0x8a   :  { %v68_v11 = vadd.f32 %v67_v10, %v66_v9 }
  0x8c   :  { %v69_v12 = vrot.slane %v68_v11, 2 }
  0x8e   :  { %v70_v13 = vadd.f32 %v69_v12, %v68_v11 }
  0x90   :  { %v71_v14 = vrot.slane %v70_v13, 1 }
  0x92   :  { %v72_v15 = vadd.f32 %v71_v14, %v70_v13 }
  0x94   :  { %94 = vpush %v72_v15 }
  0xc5   :  { %s95_s22 = spop %94 }
  0xc6   :  { %s74_s23 = smul.f32 0.00048828125, %s95_s22 }
  0xc8   :  { %76 = sst [smem:[#allocation8]] %s74_s23 }
  0xc9   :  { %85 = dma.smem_to_hbm %s171_s24, 16, %s83_s21, [#allocation5]  }
  0xca   :  { %165 = dma.done.wait [#allocation5], 16  }
  0xcb   :  { %166 = vsyncadd [#allocation5], 4294967280 }
  0xcc   :  { %90 = sfence }
  0xcd   :  { %91 = vsyncpa [#allocation4], 1 }
  0xce   :  { %92 = vsyncpa [#allocation7], 1 }
  0xcf   :  { %93 = vsyncpa [#allocation5], 1 }

</bundles_post_ra>
